<compile_context>
chip_gen: v7x
topology: tpu7x:2x2x1
jax: 0.10.0
libtpu: 0.0.40
codegen_flags: <defaults>
</compile_context>

<pallas_src>
import functools

import jax
import jax.numpy as jnp
from jax import lax
from jax.experimental import pallas as pl
from jax.experimental.pallas import tpu as pltpu


COMPUTE_DTYPE = jnp.bfloat16
VMEM_LIMIT = 48 * 1024 * 1024


def _round_up(x, m):
    return ((x + m - 1) // m) * m


def _apply_act(r, activation):
    if activation == "relu":
        return jnp.maximum(r, 0.0)
    if activation == "sigmoid":
        return jax.nn.sigmoid(r)
    return r


# ---------------------------------------------------------------------------
# Pallas kernel: 2x2-tap stride-1 conv, one whole (row-flattened) image / step
# ---------------------------------------------------------------------------
def _conv2x2_kernel(x_ref, w_ref, b_ref, o_ref, acc_ref, *, activation, wp1):
    """x_ref: [1, (hc+2)*wp1, Cin] row-flattened padded image (+1 guard row)
       w_ref: [4, Cin, Cout]  taps (dy,dx) in ((0,0),(0,1),(1,0),(1,1))
       b_ref: [1, Cout] f32
       o_ref: [1, hc*wp1, Cout]  (column wp1-1 of every row is garbage)
       acc_ref: [hc*wp1, Cout] f32 scratch accumulator."""
    m = o_ref.shape[1]
    acc_ref[...] = jnp.dot(x_ref[0, 0:m, :], w_ref[0],
                           preferred_element_type=jnp.float32)
    for t, off in ((1, 1), (2, wp1), (3, wp1 + 1)):
        acc_ref[...] += jnp.dot(x_ref[0, off:off + m, :], w_ref[t],
                                preferred_element_type=jnp.float32)
    r = _apply_act(acc_ref[...] + b_ref[...], activation)
    o_ref[0] = r.astype(o_ref.dtype)


def _conv2x2(x_flat, w_cat, bias, *, hc, wp1, activation, out_dtype):
    """x_flat: [N, (hc+2)*wp1, Cin] -> [N, hc*wp1, Cout] (wrap col included)."""
    N, m_in, Cin = x_flat.shape
    Cout = w_cat.shape[-1]
    m_out = hc * wp1
    assert m_in == (hc + 2) * wp1
    bias2 = bias.reshape(1, Cout).astype(jnp.float32)
    kernel = functools.partial(_conv2x2_kernel, activation=activation, wp1=wp1)

    return pl.pallas_call(
        kernel,
        out_shape=jax.ShapeDtypeStruct((N, m_out, Cout), out_dtype),
        grid_spec=pltpu.PrefetchScalarGridSpec(
            num_scalar_prefetch=0,
            grid=(N,),
            in_specs=[
                pl.BlockSpec((1, m_in, Cin), lambda i: (i, 0, 0)),
                pl.BlockSpec((4, Cin, Cout), lambda i: (0, 0, 0)),
                pl.BlockSpec((1, Cout), lambda i: (0, 0)),
            ],
            out_specs=pl.BlockSpec((1, m_out, Cout), lambda i: (i, 0, 0)),
            scratch_shapes=[pltpu.VMEM((m_out, Cout), jnp.float32)],
        ),
        compiler_params=pltpu.CompilerParams(
            dimension_semantics=("parallel",),
            vmem_limit_bytes=VMEM_LIMIT),
    )(x_flat, w_cat, bias2)


# ---------------------------------------------------------------------------
# Conv2d(k=3,s=2,p=1)  =  space-to-depth + 2x2-tap conv
# ---------------------------------------------------------------------------
def _prep_conv_s2_weight(w_pt, dtype):
    """w_pt: [Cout, Cin, 3, 3] -> [4 taps, 4*Cin, Cout]."""
    Cout, Cin = w_pt.shape[0], w_pt.shape[1]
    w = jnp.zeros((4, 4 * Cin, Cout), jnp.float32)
    for dy in range(2):
        for dx in range(2):
            t = 2 * dy + dx
            for ay in range(2):
                for bx in range(2):
                    ky, kx = 2 * dy + ay, 2 * dx + bx
                    if ky <= 2 and kx <= 2:
                        p = 2 * ay + bx
                        w = w.at[t, p * Cin:(p + 1) * Cin, :].set(
                            jnp.transpose(w_pt[:, :, ky, kx], (1, 0)))
    return w.astype(dtype)


def conv3x3_s2_apply(x, w_cat, b, *, activation, out_dtype, raw_output=False):
    """PyTorch Conv2d(Cin,Cout,3,2,1) on NHWC x: [N,H,W,Cin].
       raw_output=True returns the kernel's flat [N, Hc*(Wc+1), Cout] slab
       (wrap column at x=Wc kept; consumer must ignore it)."""
    N, H, W, Cin = x.shape
    Hc, Wc = H // 2, W // 2
    Wp1 = Wc + 1
    # pad (1 top, 3 bottom, 1 left, 1 right): bottom 2 extra rows become the
    # zero wrap-guard s2d row; then space-to-depth in one fused XLA pass.
    xp = jnp.pad(x.astype(w_cat.dtype), ((0, 0), (1, 3), (1, 1), (0, 0)))
    xp = xp.reshape(N, Hc + 2, 2, Wp1, 2, Cin)
    xflat = jnp.transpose(xp, (0, 1, 3, 2, 4, 5)).reshape(
        N, (Hc + 2) * Wp1, 4 * Cin)
    out = _conv2x2(xflat, w_cat, b, hc=Hc, wp1=Wp1,
                   activation=activation, out_dtype=out_dtype)
    if raw_output:
        return out
    return out.reshape(N, Hc, Wp1, -1)[:, :, :Wc, :]


# ---------------------------------------------------------------------------
# ConvTranspose2d(k=3,s=2,p=1,op=1)  =  2x2-tap conv (parity outputs) + d2s
# ---------------------------------------------------------------------------
def _prep_deconv_weight(w_pt, b, dtype):
    """w_pt: [Cin, Cout, 3, 3] -> ([4 taps, Cin, 4*Cout], bias [4*Cout])."""
    Cin, Cout = w_pt.shape[0], w_pt.shape[1]
    w = jnp.zeros((4, Cin, 4 * Cout), jnp.float32)
    for dy in range(2):
        for dx in range(2):
            t = 2 * dy + dx
            for py in range(2):
                for px in range(2):
                    ky, kx = 1 + py - 2 * dy, 1 + px - 2 * dx
                    if 0 <= ky <= 2 and 0 <= kx <= 2:
                        q = 2 * py + px
                        w = w.at[t, :, q * Cout:(q + 1) * Cout].set(
                            w_pt[:, :, ky, kx])
    b_cat = jnp.tile(b.astype(jnp.float32), 4)
    return w.astype(dtype), b_cat


def deconv_apply(x, w_cat, b_cat, *, activation, out_dtype):
    """PyTorch ConvTranspose2d(...,3,2,1,output_padding=1) on NHWC x."""
    N, H, W, Cin = x.shape
    Cout = w_cat.shape[-1] // 4
    Wp1 = W + 1
    # pad right/bottom by 1 (transposed-conv boundary) + 1 extra guard row.
    xp = jnp.pad(x.astype(w_cat.dtype), ((0, 0), (0, 2), (0, 1), (0, 0)))
    xflat = xp.reshape(N, (H + 2) * Wp1, Cin)
    y = _conv2x2(xflat, w_cat, b_cat, hc=H, wp1=Wp1,
                 activation=activation, out_dtype=out_dtype)
    y = y.reshape(N, H, Wp1, 2, 2, Cout)[:, :, :W]
    y = jnp.transpose(y, (0, 1, 3, 2, 4, 5)).reshape(N, 2 * H, 2 * W, Cout)
    return y


# ---------------------------------------------------------------------------
# Pallas kernels: fused linear layers
# ---------------------------------------------------------------------------
def _encfc_kernel(a_ref, w_ref, b_ref, o_ref, acc_ref):
    """K-streaming GEMV with a lane-dense transposed weight ([Nout, K]):
       out[m, n] = sum_k a[m, k] * w[n, k]  (flash-attn style NT contraction)."""
    @pl.when(pl.program_id(0) == 0)
    def _():
        acc_ref[...] = jnp.zeros_like(acc_ref)

    acc_ref[...] += lax.dot_general(
        a_ref[...], w_ref[...],
        dimension_numbers=(((1,), (1,)), ((), ())),
        preferred_element_type=jnp.float32)

    @pl.when(pl.program_id(0) == pl.num_programs(0) - 1)
    def _():
        o_ref[...] = (acc_ref[...] + b_ref[...]).astype(o_ref.dtype)


def pallas_linear_nt(a, w_t, bias, *, out_dtype=jnp.float32):
    """out = a @ w_t.T + bias ; a: [M, K], w_t: [Nout, K] (lane-dense)."""
    M, K = a.shape
    Nout = w_t.shape[0]
    Mp = max(_round_up(M, 8), 8)
    a = a.astype(w_t.dtype)
    if Mp != M:
        a = jnp.pad(a, ((0, Mp - M), (0, 0)))
    nk = 4 if K % (4 * 128) == 0 else 1
    tk = K // nk
    bias2 = bias.reshape(1, Nout).astype(jnp.float32)

    out = pl.pallas_call(
        _encfc_kernel,
        out_shape=jax.ShapeDtypeStruct((Mp, Nout), out_dtype),
        grid_spec=pltpu.PrefetchScalarGridSpec(
            num_scalar_prefetch=0,
            grid=(nk,),
            in_specs=[pl.BlockSpec((Mp, tk), lambda k: (0, k)),
                      pl.BlockSpec((Nout, tk), lambda k: (0, k)),
                      pl.BlockSpec((1, Nout), lambda k: (0, 0))],
            out_specs=pl.BlockSpec((Mp, Nout), lambda k: (0, 0)),
            scratch_shapes=[pltpu.VMEM((Mp, Nout), jnp.float32)]),
        compiler_params=pltpu.CompilerParams(
            dimension_semantics=("arbitrary",),
            vmem_limit_bytes=VMEM_LIMIT),
    )(a, w_t, bias2)
    return out[:M]


def _linear_kernel(a_ref, w_ref, b_ref, o_ref, *, activation):
    r = jnp.dot(a_ref[...], w_ref[...],
                preferred_element_type=jnp.float32) + b_ref[...]
    o_ref[...] = _apply_act(r, activation).astype(o_ref.dtype)


def pallas_linear_nsplit(a, w, bias, *, activation=None, out_dtype, tn=16384):
    """out = act(a @ w + bias); a:[M,K], w:[K,N] lane-dense, N tiled."""
    M, K = a.shape
    K2, Nd = w.shape
    assert K == K2
    Mp = max(_round_up(M, 8), 8)
    a = a.astype(w.dtype)
    if Mp != M:
        a = jnp.pad(a, ((0, Mp - M), (0, 0)))
    if Nd % tn != 0:
        tn = Nd
    bias2 = bias.reshape(1, Nd).astype(jnp.float32)

    out = pl.pallas_call(
        functools.partial(_linear_kernel, activation=activation),
        out_shape=jax.ShapeDtypeStruct((Mp, Nd), out_dtype),
        grid_spec=pltpu.PrefetchScalarGridSpec(
            num_scalar_prefetch=0,
            grid=(Nd // tn,),
            in_specs=[pl.BlockSpec((Mp, K), lambda j: (0, 0)),
                      pl.BlockSpec((K, tn), lambda j: (0, j)),
                      pl.BlockSpec((1, tn), lambda j: (0, j))],
            out_specs=pl.BlockSpec((Mp, tn), lambda j: (0, j))),
        compiler_params=pltpu.CompilerParams(
            dimension_semantics=("parallel",),
            vmem_limit_bytes=VMEM_LIMIT),
    )(a, w, bias2)
    return out[:M]


# ---------------------------------------------------------------------------
# Pallas kernel: encoder LSTM + Binary-Concrete + decoder LSTM (one launch)
# ---------------------------------------------------------------------------
def _seq_rnn_kernel(x_ref, u_ref,
                    ewx0, ewh0, eb0, ewx1, ewh1, eb1,
                    dwx0, dwh0, db0, dwx1, dwh1, db1,
                    h_out, z_out, d_out, *,
                    temperature, hard, noise_ratio, eps):
    """PyTorch gate order (i,f,g,o), zero initial states, T unrolled."""
    T, B, L = x_ref.shape
    H = L

    def cell(x, h, c, wx, wh, b):
        z = (jnp.dot(x, wx[...], preferred_element_type=jnp.float32)
             + jnp.dot(h, wh[...], preferred_element_type=jnp.float32)
             + b[...])
        i = jax.nn.sigmoid(z[:, 0:H])
        f = jax.nn.sigmoid(z[:, H:2 * H])
        g = jnp.tanh(z[:, 2 * H:3 * H])
        o = jax.nn.sigmoid(z[:, 3 * H:4 * H])
        c = f * c + i * g
        h = o * jnp.tanh(c)
        return h, c

    zero = jnp.zeros((B, H), jnp.float32)
    eh0 = ec0 = eh1 = ec1 = zero
    dh0 = dc0 = dh1 = dc1 = zero
    for t in range(T):                                   # static, unrolled
        x = x_ref[t]
        eh0, ec0 = cell(x, eh0, ec0, ewx0, ewh0, eb0)
        eh1, ec1 = cell(eh0, eh1, ec1, ewx1, ewh1, eb1)
        h_out[t] = eh1

        u = u_ref[t]                                     # Binary Concrete
        noise = noise_ratio * (jnp.log(u + eps) - jnp.log(1.0 - u + eps))
        y = jax.nn.sigmoid((eh1 + noise) / temperature)
        if hard:
            # TODO(synk): straight-through forward value only (no detach).
            y = (y > 0.5).astype(jnp.float32)
        z_out[t] = y

        dh0, dc0 = cell(y, dh0, dc0, dwx0, dwh0, db0)    # decoder LSTM
        dh1, dc1 = cell(dh0, dh1, dc1, dwx1, dwh1, db1)
        d_out[t] = dh1


def pallas_seq_rnn(x_btl, u, enc_rnn, dec_rnn, *, temperature, hard,
                   noise_ratio, eps=1e-8):
    B, T, L = x_btl.shape
    Bp = max(_round_up(B, 8), 8)
    x_tbl = jnp.transpose(x_btl, (1, 0, 2)).astype(jnp.float32)
    u_tbl = jnp.transpose(u.reshape(B, T, L), (1, 0, 2)).astype(jnp.float32)
    if Bp != B:
        x_tbl = jnp.pad(x_tbl, ((0, 0), (0, Bp - B), (0, 0)))
        u_tbl = jnp.pad(u_tbl, ((0, 0), (0, Bp - B), (0, 0)),
                        constant_values=0.5)
    kernel = functools.partial(
        _seq_rnn_kernel, temperature=float(temperature), hard=bool(hard),
        noise_ratio=float(noise_ratio), eps=float(eps))
    h_seq, z_seq, d_seq = pl.pallas_call(
        kernel,
        out_shape=(jax.ShapeDtypeStruct((T, Bp, L), jnp.float32),
                   jax.ShapeDtypeStruct((T, Bp, L), jnp.float32),
                   jax.ShapeDtypeStruct((T, Bp, L), jnp.float32)),
        compiler_params=pltpu.CompilerParams(vmem_limit_bytes=VMEM_LIMIT),
    )(x_tbl, u_tbl,
      enc_rnn["wx0"], enc_rnn["wh0"], enc_rnn["b0"],
      enc_rnn["wx1"], enc_rnn["wh1"], enc_rnn["b1"],
      dec_rnn["wx0"], dec_rnn["wh0"], dec_rnn["b0"],
      dec_rnn["wx1"], dec_rnn["wh1"], dec_rnn["b1"])
    to_btl = lambda a: jnp.transpose(a[:, :B], (1, 0, 2))
    return to_btl(h_seq), to_btl(z_seq), to_btl(d_seq)


# ---------------------------------------------------------------------------
# Parameters (PyTorch layout) and one-time packing into kernel layout
# ---------------------------------------------------------------------------
def init_params(key, in_channels=3, out_channels=3, latent_dim=32, feat_hw=32):
    flat = 64 * feat_hw * feat_hw             # == 64*8*8*4**2 when feat_hw==32
    keys = iter(jax.random.split(key, 64))

    def nrm(shape, scale=0.05):
        return scale * jax.random.normal(next(keys), shape, dtype=jnp.float32)

    def lstm_layer(in_dim, hid):
        return {"wih": nrm((4 * hid, in_dim)), "whh": nrm((4 * hid, hid)),
                "bih": nrm((4 * hid,)), "bhh": nrm((4 * hid,))}

    return {
        "enc_conv1_w": nrm((64, in_channels, 3, 3)), "enc_conv1_b": nrm((64,)),
        "enc_conv2_w": nrm((64, 64, 3, 3)), "enc_conv2_b": nrm((64,)),
        "enc_conv3_w": nrm((64, 64, 3, 3)), "enc_conv3_b": nrm((64,)),
        "enc_fc_w": nrm((latent_dim, flat), scale=0.01),
        "enc_fc_b": nrm((latent_dim,)),
        "dec_fc_w": nrm((flat, latent_dim)), "dec_fc_b": nrm((flat,)),
        "dec_deconv1_w": nrm((64, 64, 3, 3)), "dec_deconv1_b": nrm((64,)),
        "dec_deconv2_w": nrm((64, 64, 3, 3)), "dec_deconv2_b": nrm((64,)),
        "dec_deconv3_w": nrm((64, out_channels, 3, 3)),
        "dec_deconv3_b": nrm((out_channels,)),
        "enc_rnn": {"l0": lstm_layer(latent_dim, latent_dim),
                    "l1": lstm_layer(latent_dim, latent_dim)},
        "dec_rnn": {"l0": lstm_layer(latent_dim, latent_dim),
                    "l1": lstm_layer(latent_dim, latent_dim)},
    }


def _prep_lstm(rnn):
    def layer(p):
        return (jnp.transpose(p["wih"], (1, 0)).astype(jnp.float32),
                jnp.transpose(p["whh"], (1, 0)).astype(jnp.float32),
                (p["bih"] + p["bhh"]).reshape(1, -1).astype(jnp.float32))
    wx0, wh0, b0 = layer(rnn["l0"])
    wx1, wh1, b1 = layer(rnn["l1"])
    return {"wx0": wx0, "wh0": wh0, "b0": b0,
            "wx1": wx1, "wh1": wh1, "b1": b1}


def prepare_params(params, dtype=COMPUTE_DTYPE):
    """One-time (outside jit) packing/permutation/casting of all weights."""
    L, flat = params["enc_fc_w"].shape
    Hf = int(round((flat // 64) ** 0.5))
    Wf = Hf

    prep = {}
    for i in (1, 2, 3):
        prep[f"enc{i}_w"] = _prep_conv_s2_weight(params[f"enc_conv{i}_w"], dtype)
        prep[f"enc{i}_b"] = params[f"enc_conv{i}_b"]
        w, b = _prep_deconv_weight(params[f"dec_deconv{i}_w"],
                                   params[f"dec_deconv{i}_b"], dtype)
        prep[f"dec{i}_w"], prep[f"dec{i}_b"] = w, b

    # enc_fc: lane-dense transposed weight [L, K]; zero columns absorb conv3's
    # wrap column so conv3's raw kernel output is consumed with no slice pass.
    w = params["enc_fc_w"].reshape(L, 64, Hf, Wf)            # [l, c, h, w]
    w = jnp.transpose(w, (0, 2, 3, 1))                       # [l, h, w, c]
    w = jnp.pad(w, ((0, 0), (0, 0), (0, 1), (0, 0)))         # wrap col -> 0
    prep["enc_fc_wt"] = w.reshape(L, Hf * (Wf + 1) * 64).astype(dtype)
    prep["enc_fc_b"] = params["enc_fc_b"].astype(jnp.float32)

    # dec_fc: lane-dense [L, flat] emitting NHWC-flattened activations.
    w = params["dec_fc_w"].reshape(64, Hf, Wf, L)            # [c, h, w, l]
    prep["dec_fc_w"] = jnp.transpose(w, (3, 1, 2, 0)).reshape(
        L, Hf * Wf * 64).astype(dtype)
    prep["dec_fc_b"] = jnp.transpose(
        params["dec_fc_b"].reshape(64, Hf, Wf), (1, 2, 0)).reshape(-1).astype(
            jnp.float32)

    prep["enc_rnn"] = _prep_lstm(params["enc_rnn"])
    prep["dec_rnn"] = _prep_lstm(params["dec_rnn"])
    return prep


# ---------------------------------------------------------------------------
# Full forward pass (Seq2SeqBinaryVAE.forward)
# ---------------------------------------------------------------------------
def seq2seq_binary_vae_forward(prep, x, u_noise, *, temperature=1.0,
                               hard=False, noise_ratio=0.1):
    B, T, C, H, W = x.shape
    N = B * T
    Hf, Wf = H // 8, W // 8
    L = prep["enc_fc_wt"].shape[0]

    xf = jnp.transpose(x.reshape(N, C, H, W), (0, 2, 3, 1))          # NHWC

    # --- ConvEncoder ---
    h = conv3x3_s2_apply(xf, prep["enc1_w"], prep["enc1_b"],
                         activation="relu", out_dtype=COMPUTE_DTYPE)
    h = conv3x3_s2_apply(h, prep["enc2_w"], prep["enc2_b"],
                         activation="relu", out_dtype=COMPUTE_DTYPE)
    h3_raw = conv3x3_s2_apply(h, prep["enc3_w"], prep["enc3_b"],
                              activation=None, out_dtype=COMPUTE_DTYPE,
                              raw_output=True)                       # wrap col kept
    logits = pallas_linear_nt(h3_raw.reshape(N, -1), prep["enc_fc_wt"],
                              prep["enc_fc_b"], out_dtype=jnp.float32)
    x_conv = logits.reshape(B, T, L)

    # --- EncoderRNN + Binary Concrete + DecoderRNN (fused) ---
    h_seq, z_seq, d_seq = pallas_seq_rnn(
        x_conv, u_noise, prep["enc_rnn"], prep["dec_rnn"],
        temperature=temperature, hard=hard, noise_ratio=noise_ratio)

    # --- ConvDecoder ---
    g = pallas_linear_nsplit(d_seq.reshape(N, L), prep["dec_fc_w"],
                             prep["dec_fc_b"], activation=None,
                             out_dtype=COMPUTE_DTYPE, tn=16384)
    g = g.reshape(N, Hf, Wf, 64)                                     # NHWC
    g = deconv_apply(g, prep["dec1_w"], prep["dec1_b"],
                     activation="relu", out_dtype=COMPUTE_DTYPE)
    g = deconv_apply(g, prep["dec2_w"], prep["dec2_b"],
                     activation="relu", out_dtype=COMPUTE_DTYPE)
    g = deconv_apply(g, prep["dec3_w"], prep["dec3_b"],
                     activation="sigmoid", out_dtype=COMPUTE_DTYPE)
    x_recon = jnp.transpose(g.astype(jnp.float32),
                            (0, 3, 1, 2)).reshape(B, T, C, H, W)
    return x_recon, h_seq, z_seq


# ---------------------------------------------------------------------------
# Self-tests of the conv/deconv/linear reformulations against XLA references
# ---------------------------------------------------------------------------
def _self_test():
    key = jax.random.PRNGKey(7)
    ks = jax.random.split(key, 10)

    # Conv2d(k=3, s=2, p=1)
    x = jax.random.uniform(ks[0], (2, 16, 16, 5), jnp.float32)
    w = 0.1 * jax.random.normal(ks[1], (7, 5, 3, 3), jnp.float32)
    b = 0.1 * jax.random.normal(ks[2], (7,), jnp.float32)
    got = conv3x3_s2_apply(x, _prep_conv_s2_weight(w, jnp.float32), b,
                           activation=None, out_dtype=jnp.float32)
    ref = lax.conv_general_dilated(
        x, jnp.transpose(w, (2, 3, 1, 0)), (2, 2), ((1, 1), (1, 1)),
        dimension_numbers=("NHWC", "HWIO", "NHWC")) + b
    assert float(jnp.max(jnp.abs(got - ref))) < 5e-2, "conv self-test failed"

    # ConvTranspose2d(k=3, s=2, p=1, output_padding=1)
    x = jax.random.uniform(ks[3], (2, 8, 8, 5), jnp.float32)
    w = 0.1 * jax.random.normal(ks[4], (5, 6, 3, 3), jnp.float32)
    b = 0.1 * jax.random.normal(ks[5], (6,), jnp.float32)
    wd, bd = _prep_deconv_weight(w, b, jnp.float32)
    got = deconv_apply(x, wd, bd, activation=None, out_dtype=jnp.float32)
    ref = lax.conv_general_dilated(
        x, jnp.transpose(jnp.flip(w, (2, 3)), (2, 3, 0, 1)), (1, 1),
        ((1, 2), (1, 2)), lhs_dilation=(2, 2),
        dimension_numbers=("NHWC", "HWIO", "NHWC")) + b
    assert float(jnp.max(jnp.abs(got - ref))) < 5e-2, "deconv self-test failed"

    # enc_fc-style NT streaming linear and dec_fc-style N-split linear
    a = jax.random.normal(ks[6], (3, 1024), jnp.float32)
    wt = 0.05 * jax.random.normal(ks[7], (32, 1024), jnp.float32)
    bb = 0.05 * jax.random.normal(ks[8], (32,), jnp.float32)
    got = pallas_linear_nt(a, wt, bb, out_dtype=jnp.float32)
    ref = a @ wt.T + bb
    assert float(jnp.max(jnp.abs(got - ref))) < 3e-2, "nt linear failed"

    w2 = 0.05 * jax.random.normal(ks[9], (32, 256), jnp.float32)
    b2 = jnp.zeros((256,), jnp.float32)
    got = pallas_linear_nsplit(a[:, :32], w2, b2, activation=None,
                               out_dtype=jnp.float32, tn=128)
    ref = a[:, :32] @ w2 + b2
    assert float(jnp.max(jnp.abs(got - ref))) < 3e-2, "nsplit linear failed"


# ---------------------------------------------------------------------------
if __name__ == "__main__":
    _self_test()

    key = jax.random.PRNGKey(0)
    kp, kx, ku = jax.random.split(key, 3)

    # H = W = 256 is forced by the module's hard-coded Linear(64*8*8*4**2).
    B, T, C, H, W = 2, 2, 3, 256, 256
    latent_dim = 32

    params = init_params(kp, in_channels=C, out_channels=C,
                         latent_dim=latent_dim, feat_hw=H // 8)
    prep = prepare_params(params, dtype=COMPUTE_DTYPE)   # once, outside jit

    x = jax.random.uniform(kx, (B, T, C, H, W), jnp.float32)
    u = jax.random.uniform(ku, (B * T, latent_dim), jnp.float32)

    fwd = jax.jit(functools.partial(seq2seq_binary_vae_forward,
                                    temperature=1.0, hard=False,
                                    noise_ratio=0.1))
    x_recon, h_seq, z_seq = fwd(prep, x, u)
    jax.block_until_ready((x_recon, h_seq, z_seq))

    assert x_recon.shape == (B, T, C, H, W)
    assert h_seq.shape == (B, T, latent_dim)
    assert z_seq.shape == (B, T, latent_dim)
    assert bool(jnp.all(jnp.isfinite(x_recon)))
    assert bool(jnp.all((x_recon >= 0.0) & (x_recon <= 1.0)))
    assert bool(jnp.all((z_seq >= 0.0) & (z_seq <= 1.0)))
    print("KERNEL_OK")
</pallas_src>

<mosaic_0001>
module attributes {stable_mosaic.version = 11 : i64} {
  func.func @_conv2x2_kernel(%arg0: i32, %arg1: memref<1x90x20xf32, #tpu.memory_space<vmem>>, %arg2: memref<4x20x7xf32, #tpu.memory_space<vmem>>, %arg3: memref<1x7xf32, #tpu.memory_space<vmem>>, %arg4: memref<1x72x7xf32, #tpu.memory_space<vmem>>, %arg5: memref<72x7xf32, #tpu.memory_space<vmem>>) attributes {dimension_semantics = [#tpu.dimension_semantics<parallel>], iteration_bounds = array<i64: 2>, scalar_prefetch = 0 : i64, scratch_operands = 1 : i64, tpu.core_type = #tpu.core_type<tc>, window_params = [{transform_indices = @transform_0, window_bounds = array<i64: 1, 90, 20>}, {pipeline_mode = #tpu.pipeline_mode<synchronous>, transform_indices = @transform_1, window_bounds = array<i64: 4, 20, 7>}, {pipeline_mode = #tpu.pipeline_mode<synchronous>, transform_indices = @transform_2, window_bounds = array<i64: 1, 7>}, {transform_indices = @transform_3, window_bounds = array<i64: 1, 72, 7>}]} {
    %c0 = arith.constant 0 : index
    %c0_0 = arith.constant 0 : index
    %c0_1 = arith.constant 0 : index
    %0 = vector.load %arg1[%c0, %c0_0, %c0_1] : memref<1x90x20xf32, #tpu.memory_space<vmem>>, vector<1x72x20xf32>
    %1 = vector.shape_cast %0 : vector<1x72x20xf32> to vector<72x20xf32>
    %c0_2 = arith.constant 0 : index
    %c0_3 = arith.constant 0 : index
    %c0_4 = arith.constant 0 : index
    %2 = vector.load %arg2[%c0_2, %c0_3, %c0_4] : memref<4x20x7xf32, #tpu.memory_space<vmem>>, vector<1x20x7xf32>
    %3 = vector.shape_cast %2 : vector<1x20x7xf32> to vector<20x7xf32>
    %cst = arith.constant dense<0.000000e+00> : vector<72x7xf32>
    %4 = tpu.matmul %1, %3, %cst {dimension_numbers = #tpu.dot_dimension_numbers<[1], [0], [0], [1], [0, 0, 1, 1], [], []>} : vector<72x20xf32>, vector<20x7xf32>, vector<72x7xf32> -> vector<72x7xf32>
    %c0_5 = arith.constant 0 : index
    %c0_6 = arith.constant 0 : index
    %5 = vector.load %arg5[%c0_5, %c0_6] : memref<72x7xf32, #tpu.memory_space<vmem>>, vector<72x7xf32>
    tpu.vector_store %arg5[%c0_5, %c0_6], %4 {strides = array<i32>} : memref<72x7xf32, #tpu.memory_space<vmem>>, vector<72x7xf32>,
    %c0_7 = arith.constant 0 : index
    %c0_8 = arith.constant 0 : index
    %6 = vector.load %arg5[%c0_7, %c0_8] : memref<72x7xf32, #tpu.memory_space<vmem>>, vector<72x7xf32>
    %c0_9 = arith.constant 0 : index
    %c1 = arith.constant 1 : index
    %c0_10 = arith.constant 0 : index
    %7 = vector.load %arg1[%c0_9, %c1, %c0_10] : memref<1x90x20xf32, #tpu.memory_space<vmem>>, vector<1x72x20xf32>
    %8 = vector.shape_cast %7 : vector<1x72x20xf32> to vector<72x20xf32>
    %c1_11 = arith.constant 1 : index
    %c0_12 = arith.constant 0 : index
    %c0_13 = arith.constant 0 : index
    %9 = vector.load %arg2[%c1_11, %c0_12, %c0_13] : memref<4x20x7xf32, #tpu.memory_space<vmem>>, vector<1x20x7xf32>
    %10 = vector.shape_cast %9 : vector<1x20x7xf32> to vector<20x7xf32>
    %cst_14 = arith.constant dense<0.000000e+00> : vector<72x7xf32>
    %11 = tpu.matmul %8, %10, %cst_14 {dimension_numbers = #tpu.dot_dimension_numbers<[1], [0], [0], [1], [0, 0, 1, 1], [], []>} : vector<72x20xf32>, vector<20x7xf32>, vector<72x7xf32> -> vector<72x7xf32>
    %12 = arith.addf %6, %11 : vector<72x7xf32>
    %c0_15 = arith.constant 0 : index
    %c0_16 = arith.constant 0 : index
    %13 = vector.load %arg5[%c0_15, %c0_16] : memref<72x7xf32, #tpu.memory_space<vmem>>, vector<72x7xf32>
    tpu.vector_store %arg5[%c0_15, %c0_16], %12 {strides = array<i32>} : memref<72x7xf32, #tpu.memory_space<vmem>>, vector<72x7xf32>,
    %c0_17 = arith.constant 0 : index
    %c0_18 = arith.constant 0 : index
    %14 = vector.load %arg5[%c0_17, %c0_18] : memref<72x7xf32, #tpu.memory_space<vmem>>, vector<72x7xf32>
    %c0_19 = arith.constant 0 : index
    %c9 = arith.constant 9 : index
    %c0_20 = arith.constant 0 : index
    %15 = vector.load %arg1[%c0_19, %c9, %c0_20] : memref<1x90x20xf32, #tpu.memory_space<vmem>>, vector<1x72x20xf32>
    %16 = vector.shape_cast %15 : vector<1x72x20xf32> to vector<72x20xf32>
    %c2 = arith.constant 2 : index
    %c0_21 = arith.constant 0 : index
    %c0_22 = arith.constant 0 : index
    %17 = vector.load %arg2[%c2, %c0_21, %c0_22] : memref<4x20x7xf32, #tpu.memory_space<vmem>>, vector<1x20x7xf32>
    %18 = vector.shape_cast %17 : vector<1x20x7xf32> to vector<20x7xf32>
    %cst_23 = arith.constant dense<0.000000e+00> : vector<72x7xf32>
    %19 = tpu.matmul %16, %18, %cst_23 {dimension_numbers = #tpu.dot_dimension_numbers<[1], [0], [0], [1], [0, 0, 1, 1], [], []>} : vector<72x20xf32>, vector<20x7xf32>, vector<72x7xf32> -> vector<72x7xf32>
    %20 = arith.addf %14, %19 : vector<72x7xf32>
    %c0_24 = arith.constant 0 : index
    %c0_25 = arith.constant 0 : index
    %21 = vector.load %arg5[%c0_24, %c0_25] : memref<72x7xf32, #tpu.memory_space<vmem>>, vector<72x7xf32>
    tpu.vector_store %arg5[%c0_24, %c0_25], %20 {strides = array<i32>} : memref<72x7xf32, #tpu.memory_space<vmem>>, vector<72x7xf32>,
    %c0_26 = arith.constant 0 : index
    %c0_27 = arith.constant 0 : index
    %22 = vector.load %arg5[%c0_26, %c0_27] : memref<72x7xf32, #tpu.memory_space<vmem>>, vector<72x7xf32>
    %c0_28 = arith.constant 0 : index
    %c10 = arith.constant 10 : index
    %c0_29 = arith.constant 0 : index
    %23 = vector.load %arg1[%c0_28, %c10, %c0_29] : memref<1x90x20xf32, #tpu.memory_space<vmem>>, vector<1x72x20xf32>
    %24 = vector.shape_cast %23 : vector<1x72x20xf32> to vector<72x20xf32>
    %c3 = arith.constant 3 : index
    %c0_30 = arith.constant 0 : index
    %c0_31 = arith.constant 0 : index
    %25 = vector.load %arg2[%c3, %c0_30, %c0_31] : memref<4x20x7xf32, #tpu.memory_space<vmem>>, vector<1x20x7xf32>
    %26 = vector.shape_cast %25 : vector<1x20x7xf32> to vector<20x7xf32>
    %cst_32 = arith.constant dense<0.000000e+00> : vector<72x7xf32>
    %27 = tpu.matmul %24, %26, %cst_32 {dimension_numbers = #tpu.dot_dimension_numbers<[1], [0], [0], [1], [0, 0, 1, 1], [], []>} : vector<72x20xf32>, vector<20x7xf32>, vector<72x7xf32> -> vector<72x7xf32>
    %28 = arith.addf %22, %27 : vector<72x7xf32>
    %c0_33 = arith.constant 0 : index
    %c0_34 = arith.constant 0 : index
    %29 = vector.load %arg5[%c0_33, %c0_34] : memref<72x7xf32, #tpu.memory_space<vmem>>, vector<72x7xf32>
    tpu.vector_store %arg5[%c0_33, %c0_34], %28 {strides = array<i32>} : memref<72x7xf32, #tpu.memory_space<vmem>>, vector<72x7xf32>,
    %c0_35 = arith.constant 0 : index
    %c0_36 = arith.constant 0 : index
    %30 = vector.load %arg5[%c0_35, %c0_36] : memref<72x7xf32, #tpu.memory_space<vmem>>, vector<72x7xf32>
    %c0_37 = arith.constant 0 : index
    %c0_38 = arith.constant 0 : index
    %31 = vector.load %arg3[%c0_37, %c0_38] : memref<1x7xf32, #tpu.memory_space<vmem>>, vector<1x7xf32>
    %32 = vector.broadcast %31 : vector<1x7xf32> to vector<72x7xf32>
    %33 = arith.addf %30, %32 : vector<72x7xf32>
    %c0_39 = arith.constant 0 : index
    %c0_40 = arith.constant 0 : index
    %c0_41 = arith.constant 0 : index
    %34 = vector.load %arg4[%c0_39, %c0_40, %c0_41] : memref<1x72x7xf32, #tpu.memory_space<vmem>>, vector<1x72x7xf32>
    %35 = vector.shape_cast %34 : vector<1x72x7xf32> to vector<72x7xf32>
    %36 = vector.shape_cast %33 : vector<72x7xf32> to vector<1x72x7xf32>
    tpu.vector_store %arg4[%c0_39, %c0_40, %c0_41], %36 {strides = array<i32>} : memref<1x72x7xf32, #tpu.memory_space<vmem>>, vector<1x72x7xf32>,
    return
  }
  func.func @transform_0(%arg0: i32) -> (i32, i32, i32) {
    %c0_i32 = arith.constant 0 : i32
    %c0_i32_0 = arith.constant 0 : i32
    %c0_i32_1 = arith.constant 0 : i32
    return %arg0, %c0_i32, %c0_i32_0 : i32, i32, i32
  }
  func.func @transform_1(%arg0: i32) -> (i32, i32, i32) {
    %c0_i32 = arith.constant 0 : i32
    %c0_i32_0 = arith.constant 0 : i32
    %c0_i32_1 = arith.constant 0 : i32
    %c0_i32_2 = arith.constant 0 : i32
    return %c0_i32, %c0_i32_0, %c0_i32_1 : i32, i32, i32
  }
  func.func @transform_2(%arg0: i32) -> (i32, i32) {
    %c0_i32 = arith.constant 0 : i32
    %c0_i32_0 = arith.constant 0 : i32
    %c0_i32_1 = arith.constant 0 : i32
    return %c0_i32, %c0_i32_0 : i32, i32
  }
  func.func @transform_3(%arg0: i32) -> (i32, i32, i32) {
    %c0_i32 = arith.constant 0 : i32
    %c0_i32_0 = arith.constant 0 : i32
    %c0_i32_1 = arith.constant 0 : i32
    return %arg0, %c0_i32, %c0_i32_0 : i32, i32, i32
  }
}

</mosaic_0001>

<bundles_post_ra>
// kernel: tpu_custom_call.1
= control target key start
LH: loop header
LB: loop body
LE: loop exit
PB: predicated region body
PF: predicated region fallthrough
CT: control target
= control target key end

     0   :  { %s1259_s12 = smov 0   ;;  %s1532_s0 = inlined_call_operand.vmem [shape: f32[2,90,20], index: 0, kind: input, shape index: {}]   ;;  %s1533_s1 = inlined_call_operand.vmem [shape: f32[4,20,7], index: 1, kind: input, shape index: {}]   ;;  %s1534_s2 = inlined_call_operand.vmem [shape: f32[1,7], index: 2, kind: input, shape index: {}]   ;;  %s1535_s3 = inlined_call_operand.vmem [shape: f32[2,72,7], index: 3, kind: output, shape index: {}]  }
   0x1 LB: > { %s964_s13 = sadd.s32 4294967295, %s1234_s12   ;;  %p968_p0 = scmp.ge.s32.totalorder %s1234_s12, 1  ;;  %s1234_s12 = sphi %s1259_s12, %s13_s12  }
   0x2   : > { %p137_p1 = scmp.lt.s32.totalorder %s1234_s12, 3 }
   0x4   : > { %p138_p2 = pnand %p968_p0, %p137_p1 }
   0x5   : > { %v180_v0 = vld [vmem:[%s1533_s1] sm:$0xff] (!%p138_p2)  ;;  %v181_v1 = vld [vmem:[%s1533_s1 + $0x8] sm:$0xff] (!%p138_p2)  ;;  %v1236_v2 = vmov (!%p138_p2), 0.0|0.0   ;;  %p161_p3 = scmp.lt.s32.totalorder (!%p138_p2), %s964_s13, 1  ;;  %vm1237_vm0 = vmmov (!%p138_p2), 0   ;;  %v1238_v4 = vmov (!%p138_p2), 0.0  }
   0x6   : > { %141 = sbr.rel (%p138_p2) target bundleno = 321 (0x141), region = 32  ;;  %1203 = vmatprep.subr.bf16.mxu0 (!%p138_p2), %v1236_v2  ;;  %v1204_v3 = vpack.c.bf16 (!%p138_p2), %v181_v1, %v180_v0  ;;  %1206 = vmatprep.subr.bf16.mxu1 (!%p138_p2), %v1236_v2  ;;  %v981_v5 = vld [vmem:[%s1533_s1 + $0x18] sm:$0xff] (!%p138_p2)  ;;  %v982_v6 = vld [vmem:[%s1533_s1 + $0x20] sm:$0xff] (!%p138_p2)  ;;  %v994_v7 = vld [vmem:[%s1533_s1 + $0x30] sm:$0xff] (!%p138_p2)  ;;  %vm211_vm1 = vcmask (!%p138_p2), 1043456   ;;  %vm183_vm2 = vcmask (!%p138_p2), 162816  }
   0x7   : > { %1077 = vmatprep.mubr.msk.f32.mxu0 (!%p138_p2), %vm1237_vm0, %v1238_v4  ;;  %1110 = vmatprep.mubr.msk.f32.mxu1 (!%p138_p2), %vm1237_vm0, %v1238_v4  ;;  %v995_v8 = vld [vmem:[%s1533_s1 + $0x38] sm:$0xff] (!%p138_p2)  ;;  %v1207_v9 = vpack.c.bf16 (!%p138_p2), %v982_v6, %v981_v5  ;;  %v182_v10 = vld [vmem:[%s1533_s1 + $0x10] sm:$0xf] (!%p138_p2)  ;;  %v1007_v11 = vld [vmem:[%s1533_s1 + $0x48] sm:$0xff] (!%p138_p2)  ;;  %vm325_vm3 = vcmask (!%p138_p2), 56320  }
   0x8   : > { %1205 = vmatpush3.bf16.msra.mxu0 (!%p138_p2), %v1204_v3  ;;  %v1008_v12 = vld [vmem:[%s1533_s1 + $0x50] sm:$0xff] (!%p138_p2)  ;;  %v1210_v13 = vpack.c.bf16 (!%p138_p2), %v995_v8, %v994_v7  ;;  %v983_v14 = vld [vmem:[%s1533_s1 + $0x28] sm:$0xf] (!%p138_p2)  ;;  %v996_v19 = vld [vmem:[%s1533_s1 + $0x40] sm:$0xf] (!%p138_p2) }
   0x9   : > { %1075 = vmatprep.subr.mxu0 (!%p138_p2), %v1238_v4  ;;  %1208 = vmatpush3.bf16.msra.mxu1 (!%p138_p2), %v1207_v9  ;;  %v1213_v16 = vpack.c.bf16 (!%p138_p2), %v1008_v12, %v1007_v11  ;;  %v1009_v21 = vld [vmem:[%s1533_s1 + $0x58] sm:$0xf] (!%p138_p2) }
   0xa   : > { %1108 = vmatprep.subr.mxu1 (!%p138_p2), %v1238_v4 }
   0xc   : > { %1076 = vmatpush3.msk.msra.mxu0 (!%p138_p2), %vm211_vm1, %v182_v10 }
   0xd   : > { %s1537_s13 = smov (!%p161_p3, %s964_s13), 1  ;;  %1209 = vmatprep.subr.bf16.mxu0 %v1236_v2  ;;  %1109 = vmatpush3.msk.msra.mxu1 %vm211_vm1, %v983_v14 }
   0xe   : > { %s1215_s28 = smul.u32 96, %s1537_s13  ;;  %1212 = vmatprep.subr.bf16.mxu1 %v1236_v2 }
   0xf   : > { %s1216_s17 = smul.u32 72, %s1537_s13 }
  0x10   : > { %s1310_s10 = scalar_lea.vmem %s1532_s0, %s1215_s28 }
  0x11   : > { %v171_v15 = vld [vmem:[%s1310_s10] sm:$0xff]  ;;  %v172_v18 = vld [vmem:[%s1310_s10 + $0x8] sm:$0xff]  ;;  %v173_v22 = vld [vmem:[%s1310_s10 + $0x10] sm:$0xff]  ;;  %s1489_s13 = scalar_lea.vmem %s1535_s3, %s1216_s17 }
  0x12   : > { %1078 = vmatmul.mubr.msk.f32.vlgmr.msra.gmra.mrb[0].mxu0 %vm183_vm2, %v171_v15  ;;  %v344_v17 = vld [vmem:[%s1310_s10 + $0x1] sm:$0xff]  ;;  %v345_v20 = vld [vmem:[%s1310_s10 + $0x9] sm:$0xff]  ;;  %v346_v23 = vld [vmem:[%s1310_s10 + $0x11] sm:$0xff] }
  0x13   : > { %1211 = vmatpush3.bf16.msra.mxu0 %v1210_v13  ;;  %1080 = vmatprep.mubr.msk.f32.mxu0 %vm1237_vm0, %v1238_v4  ;;  %v174_v24 = vld [vmem:[%s1310_s10 + $0x18] sm:$0xff]  ;;  %v175_v26 = vld [vmem:[%s1310_s10 + $0x20] sm:$0xff]  ;;  %v176_v28 = vld [vmem:[%s1310_s10 + $0x28] sm:$0xff] }
  0x14   : > { %1111 = vmatmul.mubr.msk.f32.vlgmr.msra.gmra.mrb[0].mxu1 %vm183_vm2, %v344_v17  ;;  %1141 = vmatprep.subr.mxu0 %v1238_v4  ;;  %v347_v25 = vld [vmem:[%s1310_s10 + $0x19] sm:$0xff]  ;;  %v348_v27 = vld [vmem:[%s1310_s10 + $0x21] sm:$0xff]  ;;  %v349_v29 = vld [vmem:[%s1310_s10 + $0x29] sm:$0xff] }
  0x15   : > { %1214 = vmatpush3.bf16.msra.mxu1 %v1213_v16  ;;  %1113 = vmatprep.mubr.msk.f32.mxu1 %vm1237_vm0, %v1238_v4  ;;  %v177_v30 = vld [vmem:[%s1310_s10 + $0x30] sm:$0xff]  ;;  %v178_v32 = vld [vmem:[%s1310_s10 + $0x38] sm:$0xff]  ;;  %v179_v34 = vld [vmem:[%s1310_s10 + $0x40] sm:$0xff] }
  0x16   : > { %1081 = vmatmul.mubr.msk.f32.gmra.mrb[2].mxu0 %vm183_vm2, %v172_v18  ;;  %1174 = vmatprep.subr.mxu1 %v1238_v4  ;;  %v350_v31 = vld [vmem:[%s1310_s10 + $0x31] sm:$0xff]  ;;  %v351_v33 = vld [vmem:[%s1310_s10 + $0x39] sm:$0xff]  ;;  %v352_v35 = vld [vmem:[%s1310_s10 + $0x41] sm:$0xff] }
  0x17   : > { %1083 = vmatprep.mubr.msk.f32.mxu0 %vm1237_vm0, %v1238_v4  ;;  %1142 = vmatpush3.msk.msra.mxu0 %vm211_vm1, %v996_v19  ;;  %v704_v36 = vld [vmem:[%s1310_s10 + $0xa] sm:$0xff]  ;;  %v705_v37 = vld [vmem:[%s1310_s10 + $0x12] sm:$0xff]  ;;  %v706_v38 = vld [vmem:[%s1310_s10 + $0x1a] sm:$0xff] }
  0x18   : > { %1114 = vmatmul.mubr.msk.f32.gmra.mrb[2].mxu1 %vm183_vm2, %v345_v20  ;;  %v707_v39 = vld [vmem:[%s1310_s10 + $0x22] sm:$0xff]  ;;  %v708_v40 = vld [vmem:[%s1310_s10 + $0x2a] sm:$0xff]  ;;  %v709_v41 = vld [vmem:[%s1310_s10 + $0x32] sm:$0xff] }
  0x19   : > { %1116 = vmatprep.mubr.msk.f32.mxu1 %vm1237_vm0, %v1238_v4  ;;  %1175 = vmatpush3.msk.msra.mxu1 %vm211_vm1, %v1009_v21  ;;  %v710_v42 = vld [vmem:[%s1310_s10 + $0x3a] sm:$0xff]  ;;  %v711_v43 = vld [vmem:[%s1310_s10 + $0x42] sm:$0xff]  ;;  %v712_v45 = vld [vmem:[%s1310_s10 + $0x4a] sm:$0xff] }
  0x1a   : > { %1084 = vmatmul.mubr.msk.f32.gmra.mrb[4].mxu0 %vm183_vm2, %v173_v22  ;;  %v532_v44 = vld [vmem:[%s1310_s10 + $0x49] sm:$0xff] }
  0x1b   : > { %1086 = vmatprep.mubr.msk.f32.mxu0 %vm1237_vm0, %v1238_v4 }
  0x1c   : > { %1117 = vmatmul.mubr.msk.f32.gmra.mrb[4].mxu1 %vm183_vm2, %v346_v23 }
  0x1d   : > { %1119 = vmatprep.mubr.msk.f32.mxu1 %vm1237_vm0, %v1238_v4 }
  0x1e   : > { %1087 = vmatmul.mubr.msk.f32.gmra.mrb[6].mxu0 %vm183_vm2, %v174_v24 }
  0x1f   : > { %1089 = vmatprep.mubr.msk.f32.mxu0 %vm1237_vm0, %v1238_v4 }
  0x20   : > { %1120 = vmatmul.mubr.msk.f32.gmra.mrb[6].mxu1 %vm183_vm2, %v347_v25 }
  0x21   : > { %1122 = vmatprep.mubr.msk.f32.mxu1 %vm1237_vm0, %v1238_v4 }
  0x22   : > { %1090 = vmatmul.mubr.msk.f32.gmra.mrb[8].mxu0 %vm183_vm2, %v175_v26 }
  0x23   : > { %1092 = vmatprep.mubr.msk.f32.mxu0 %vm1237_vm0, %v1238_v4 }
  0x24   : > { %1123 = vmatmul.mubr.msk.f32.gmra.mrb[8].mxu1 %vm183_vm2, %v348_v27 }
  0x25   : > { %1125 = vmatprep.mubr.msk.f32.mxu1 %vm1237_vm0, %v1238_v4 }
  0x26   : > { %1093 = vmatmul.mubr.msk.f32.gmra.mrb[10].mxu0 %vm183_vm2, %v176_v28 }
  0x27   : > { %1095 = vmatprep.mubr.msk.f32.mxu0 %vm1237_vm0, %v1238_v4 }
  0x28   : > { %1126 = vmatmul.mubr.msk.f32.gmra.mrb[10].mxu1 %vm183_vm2, %v349_v29 }
  0x29   : > { %1128 = vmatprep.mubr.msk.f32.mxu1 %vm1237_vm0, %v1238_v4 }
  0x2a   : > { %1096 = vmatmul.mubr.msk.f32.gmra.mrb[12].mxu0 %vm183_vm2, %v177_v30 }
  0x2b   : > { %1098 = vmatprep.mubr.msk.f32.mxu0 %vm1237_vm0, %v1238_v4 }
  0x2c   : > { %1129 = vmatmul.mubr.msk.f32.gmra.mrb[12].mxu1 %vm183_vm2, %v350_v31 }
  0x2d   : > { %1131 = vmatprep.mubr.msk.f32.mxu1 %vm1237_vm0, %v1238_v4 }
  0x2e   : > { %1099 = vmatmul.mubr.msk.f32.gmra.mrb[14].mxu0 %vm183_vm2, %v178_v32 }
  0x2f   : > { %1101 = vmatprep.mubr.msk.f32.mxu0 %vm1237_vm0, %v1238_v4 }
  0x30   : > { %1132 = vmatmul.mubr.msk.f32.gmra.mrb[14].mxu1 %vm183_vm2, %v351_v33 }
  0x31   : > { %1134 = vmatprep.mubr.msk.f32.mxu1 %vm1237_vm0, %v1238_v4 }
  0x32   : > { %1102 = vmatmul.mubr.msk.f32.gmra.mrb[16].mxu0 %vm183_vm2, %v179_v34 }
  0x33   : > { %1143 = vmatprep.mubr.msk.f32.mxu0 %vm1237_vm0, %v1238_v4 }
  0x34   : > { %1135 = vmatmul.mubr.msk.f32.gmra.mrb[16].mxu1 %vm183_vm2, %v352_v35 }
  0x35   : > { %1176 = vmatprep.mubr.msk.f32.mxu1 %vm1237_vm0, %v1238_v4 }
  0x36   : > { %1144 = vmatmul.mubr.msk.f32.vlgmr.msra.gmra.mrb[18].mxu0 %vm183_vm2, %v345_v20 }
  0x37   : > { %1146 = vmatprep.mubr.msk.f32.mxu0 %vm1237_vm0, %v1238_v4 }
  0x38   : > { %1177 = vmatmul.mubr.msk.f32.vlgmr.msra.gmra.mrb[18].mxu1 %vm183_vm2, %v704_v36 }
  0x39   : > { %1179 = vmatprep.mubr.msk.f32.mxu1 %vm1237_vm0, %v1238_v4 }
  0x3a   : > { %1147 = vmatmul.mubr.msk.f32.gmra.mrb[20].mxu0 %vm183_vm2, %v346_v23 }
  0x3b   : > { %1149 = vmatprep.mubr.msk.f32.mxu0 %vm1237_vm0, %v1238_v4 }
  0x3c   : > { %1180 = vmatmul.mubr.msk.f32.gmra.mrb[20].mxu1 %vm183_vm2, %v705_v37 }
  0x3d   : > { %1182 = vmatprep.mubr.msk.f32.mxu1 %vm1237_vm0, %v1238_v4 }
  0x3e   : > { %1150 = vmatmul.mubr.msk.f32.gmra.mrb[22].mxu0 %vm183_vm2, %v347_v25 }
  0x3f   : > { %1152 = vmatprep.mubr.msk.f32.mxu0 %vm1237_vm0, %v1238_v4 }
  0x40   : > { %1183 = vmatmul.mubr.msk.f32.gmra.mrb[22].mxu1 %vm183_vm2, %v706_v38 }
  0x41   : > { %1185 = vmatprep.mubr.msk.f32.mxu1 %vm1237_vm0, %v1238_v4 }
  0x42   : > { %1153 = vmatmul.mubr.msk.f32.gmra.mrb[24].mxu0 %vm183_vm2, %v348_v27 }
  0x43   : > { %1155 = vmatprep.mubr.msk.f32.mxu0 %vm1237_vm0, %v1238_v4 }
  0x44   : > { %1186 = vmatmul.mubr.msk.f32.gmra.mrb[24].mxu1 %vm183_vm2, %v707_v39 }
  0x45   : > { %1188 = vmatprep.mubr.msk.f32.mxu1 %vm1237_vm0, %v1238_v4 }
  0x46   : > { %1156 = vmatmul.mubr.msk.f32.gmra.mrb[26].mxu0 %vm183_vm2, %v349_v29 }
  0x47   : > { %1158 = vmatprep.mubr.msk.f32.mxu0 %vm1237_vm0, %v1238_v4 }
  0x48   : > { %1189 = vmatmul.mubr.msk.f32.gmra.mrb[26].mxu1 %vm183_vm2, %v708_v40 }
  0x49   : > { %1191 = vmatprep.mubr.msk.f32.mxu1 %vm1237_vm0, %v1238_v4 }
  0x4a   : > { %1159 = vmatmul.mubr.msk.f32.gmra.mrb[28].mxu0 %vm183_vm2, %v350_v31 }
  0x4b   : > { %1161 = vmatprep.mubr.msk.f32.mxu0 %vm1237_vm0, %v1238_v4 }
  0x4c   : > { %1192 = vmatmul.mubr.msk.f32.gmra.mrb[28].mxu1 %vm183_vm2, %v709_v41 }
  0x4d   : > { %1194 = vmatprep.mubr.msk.f32.mxu1 %vm1237_vm0, %v1238_v4 }
  0x4e   : > { %1162 = vmatmul.mubr.msk.f32.gmra.mrb[30].mxu0 %vm183_vm2, %v351_v33 }
  0x4f   : > { %1164 = vmatprep.mubr.msk.f32.mxu0 %vm1237_vm0, %v1238_v4 }
  0x50   : > { %1195 = vmatmul.mubr.msk.f32.gmra.mrb[30].mxu1 %vm183_vm2, %v710_v42 }
  0x51   : > { %1197 = vmatprep.mubr.msk.f32.mxu1 %vm1237_vm0, %v1238_v4 }
  0x52   : > { %1165 = vmatmul.mubr.msk.f32.gmra.mrb[32].mxu0 %vm183_vm2, %v352_v35 }
  0x53   : > { %1167 = vmatprep.mubr.msk.f32.mxu0 %vm1237_vm0, %v1238_v4 }
  0x54   : > { %1198 = vmatmul.mubr.msk.f32.gmra.mrb[32].mxu1 %vm183_vm2, %v711_v43 }
  0x55   : > { %1200 = vmatprep.mubr.msk.f32.mxu1 %vm1237_vm0, %v1238_v4 }
  0x56   : > { %1168 = vmatmul.mubr.msk.f32.gmra.mrb[34].mxu0 %vm183_vm2, %v532_v44 }
  0x58   : > { %1201 = vmatmul.mubr.msk.f32.gmra.mrb[34].mxu1 %vm183_vm2, %v712_v45 }
  0xe5   : > { %v281_v46 = vpop.f32.mrb[0].mxu0 }
  0xe6   : > { %326 = vst.msk [vmem:[#allocation2] sm:$0xff] %vm325_vm3, %v281_v46  ;;  %v1079_v47 = vpop.f32.mrb[1].mxu0 }
  0xe7   : > { %v453_v48 = vpop.f32.mrb[0].mxu1 }
  0xe8   : > { %v1112_v49 = vpop.f32.mrb[1].mxu1 }
  0xe9   : > { %v286_v50 = vpop.f32.mrb[2].mxu0 }
  0xea   : > { %327 = vst.msk [vmem:[#allocation2 + $0x8] sm:$0xff] %vm325_vm3, %v286_v50  ;;  %v1082_v51 = vpop.f32.mrb[3].mxu0 }
  0xeb   : > { %v458_v52 = vpop.f32.mrb[2].mxu1 }
  0xec   : > { %v1115_v53 = vpop.f32.mrb[3].mxu1 }
  0xed   : > { %v291_v54 = vpop.f32.mrb[4].mxu0  ;;  %v335_v55 = vld [vmem:[#allocation2] sm:$0xff] }
  0xee   : > { %328 = vst.msk [vmem:[#allocation2 + $0x10] sm:$0xff] %vm325_vm3, %v291_v54  ;;  %v1085_v56 = vpop.f32.mrb[5].mxu0  ;;  %v497_v57 = vadd.f32 %v453_v48, %v335_v55 }
  0xef   : > { %v463_v58 = vpop.f32.mrb[4].mxu1 }
  0xf0   : > { %506 = vst.msk [vmem:[#allocation2] sm:$0xff] %vm325_vm3, %v497_v57  ;;  %v1118_v59 = vpop.f32.mrb[5].mxu1 }
  0xf1   : > { %v296_v60 = vpop.f32.mrb[6].mxu0  ;;  %v336_v61 = vld [vmem:[#allocation2 + $0x8] sm:$0xff] }
  0xf2   : > { %329 = vst.msk [vmem:[#allocation2 + $0x18] sm:$0xff] %vm325_vm3, %v296_v60  ;;  %v1088_v62 = vpop.f32.mrb[7].mxu0  ;;  %v498_v63 = vadd.f32 %v458_v52, %v336_v61 }
  0xf3   : > { %v468_v0 = vpop.f32.mrb[6].mxu1 }
  0xf4   : > { %507 = vst.msk [vmem:[#allocation2 + $0x8] sm:$0xff] %vm325_vm3, %v498_v63  ;;  %v1121_v1 = vpop.f32.mrb[7].mxu1 }
  0xf5   : > { %v301_v2 = vpop.f32.mrb[8].mxu0  ;;  %v337_v3 = vld [vmem:[#allocation2 + $0x10] sm:$0xff] }
  0xf6   : > { %330 = vst.msk [vmem:[#allocation2 + $0x20] sm:$0xff] %vm325_vm3, %v301_v2  ;;  %v1091_v4 = vpop.f32.mrb[9].mxu0  ;;  %v499_v5 = vadd.f32 %v463_v58, %v337_v3 }
  0xf7   : > { %v473_v6 = vpop.f32.mrb[8].mxu1  ;;  %v515_v32 = vld [vmem:[#allocation2] sm:$0xff] }
  0xf8   : > { %508 = vst.msk [vmem:[#allocation2 + $0x10] sm:$0xff] %vm325_vm3, %v499_v5  ;;  %v1124_v7 = vpop.f32.mrb[9].mxu1  ;;  %v1483_v4 = vld [vmem:[%s1534_s2] ss:$0 sm:$0xff] }
  0xf9   : > { %v306_v8 = vpop.f32.mrb[10].mxu0  ;;  %v338_v9 = vld [vmem:[#allocation2 + $0x18] sm:$0xff] }
  0xfa   : > { %331 = vst.msk [vmem:[#allocation2 + $0x28] sm:$0xff] %vm325_vm3, %v306_v8  ;;  %v1094_v10 = vpop.f32.mrb[11].mxu0  ;;  %v500_v11 = vadd.f32 %v468_v0, %v338_v9 }
  0xfb   : > { %v478_v12 = vpop.f32.mrb[10].mxu1  ;;  %v516_v40 = vld [vmem:[#allocation2 + $0x8] sm:$0xff] }
  0xfc   : > { %509 = vst.msk [vmem:[#allocation2 + $0x18] sm:$0xff] %vm325_vm3, %v500_v11  ;;  %v1127_v13 = vpop.f32.mrb[11].mxu1 }
  0xfd   : > { %v311_v14 = vpop.f32.mrb[12].mxu0  ;;  %v339_v15 = vld [vmem:[#allocation2 + $0x20] sm:$0xff] }
  0xfe   : > { %332 = vst.msk [vmem:[#allocation2 + $0x30] sm:$0xff] %vm325_vm3, %v311_v14  ;;  %v1097_v16 = vpop.f32.mrb[13].mxu0  ;;  %v501_v17 = vadd.f32 %v473_v6, %v339_v15 }
  0xff   : > { %v483_v18 = vpop.f32.mrb[12].mxu1  ;;  %v517_v48 = vld [vmem:[#allocation2 + $0x10] sm:$0xff] }
 0x100   : > { %510 = vst.msk [vmem:[#allocation2 + $0x20] sm:$0xff] %vm325_vm3, %v501_v17  ;;  %v1130_v19 = vpop.f32.mrb[13].mxu1 }
 0x101   : > { %v316_v20 = vpop.f32.mrb[14].mxu0  ;;  %v340_v21 = vld [vmem:[#allocation2 + $0x28] sm:$0xff] }
 0x102   : > { %333 = vst.msk [vmem:[#allocation2 + $0x38] sm:$0xff] %vm325_vm3, %v316_v20  ;;  %v1100_v22 = vpop.f32.mrb[15].mxu0  ;;  %v502_v23 = vadd.f32 %v478_v12, %v340_v21 }
 0x103   : > { %v488_v24 = vpop.f32.mrb[14].mxu1  ;;  %v518_v56 = vld [vmem:[#allocation2 + $0x18] sm:$0xff] }
 0x104   : > { %511 = vst.msk [vmem:[#allocation2 + $0x28] sm:$0xff] %vm325_vm3, %v502_v23  ;;  %v1133_v25 = vpop.f32.mrb[15].mxu1 }
 0x105   : > { %v321_v26 = vpop.f32.mrb[16].mxu0  ;;  %v341_v27 = vld [vmem:[#allocation2 + $0x30] sm:$0xff] }
 0x106   : > { %334 = vst.msk [vmem:[#allocation2 + $0x40] sm:$0xff] %vm325_vm3, %v321_v26  ;;  %v1103_v28 = vpop.f32.mrb[17].mxu0  ;;  %v503_v29 = vadd.f32 %v483_v18, %v341_v27 }
 0x107   : > { %v493_v30 = vpop.f32.mrb[16].mxu1  ;;  %v519_v0 = vld [vmem:[#allocation2 + $0x20] sm:$0xff] }
 0x108   : > { %512 = vst.msk [vmem:[#allocation2 + $0x30] sm:$0xff] %vm325_vm3, %v503_v29  ;;  %v1136_v31 = vpop.f32.mrb[17].mxu1 }
 0x109   : > { %v633_v33 = vpop.f32.mrb[18].mxu0  ;;  %v342_v34 = vld [vmem:[#allocation2 + $0x38] sm:$0xff] }
 0x10a   : > { %v677_v35 = vadd.f32 %v633_v33, %v515_v32  ;;  %v504_v36 = vadd.f32 %v488_v24, %v342_v34  ;;  %v1145_v37 = vpop.f32.mrb[19].mxu0 }
 0x10b   : > { %v813_v38 = vpop.f32.mrb[18].mxu1  ;;  %v520_v10 = vld [vmem:[#allocation2 + $0x28] sm:$0xff] }
 0x10c   : > { %686 = vst.msk [vmem:[#allocation2] sm:$0xff] %vm325_vm3, %v677_v35  ;;  %513 = vst.msk [vmem:[#allocation2 + $0x38] sm:$0xff] %vm325_vm3, %v504_v36  ;;  %v1178_v39 = vpop.f32.mrb[19].mxu1 }
 0x10d   : > { %v638_v41 = vpop.f32.mrb[20].mxu0  ;;  %v343_v42 = vld [vmem:[#allocation2 + $0x40] sm:$0xff] }
 0x10e   : > { %v678_v43 = vadd.f32 %v638_v41, %v516_v40  ;;  %v505_v44 = vadd.f32 %v493_v30, %v343_v42  ;;  %v1148_v45 = vpop.f32.mrb[21].mxu0 }
 0x10f   : > { %v818_v46 = vpop.f32.mrb[20].mxu1  ;;  %v521_v20 = vld [vmem:[#allocation2 + $0x30] sm:$0xff] }
 0x110   : > { %687 = vst.msk [vmem:[#allocation2 + $0x8] sm:$0xff] %vm325_vm3, %v678_v43  ;;  %514 = vst.msk [vmem:[#allocation2 + $0x40] sm:$0xff] %vm325_vm3, %v505_v44  ;;  %v1181_v47 = vpop.f32.mrb[21].mxu1 }
 0x111   : > { %v643_v49 = vpop.f32.mrb[22].mxu0 }
 0x112   : > { %v679_v50 = vadd.f32 %v643_v49, %v517_v48  ;;  %v1151_v51 = vpop.f32.mrb[23].mxu0 }
 0x113   : > { %v695_v52 = vld [vmem:[#allocation2] sm:$0xff]  ;;  %v823_v53 = vpop.f32.mrb[22].mxu1  ;;  %v522_v30 = vld [vmem:[#allocation2 + $0x38] sm:$0xff] }
 0x114   : > { %688 = vst.msk [vmem:[#allocation2 + $0x10] sm:$0xff] %vm325_vm3, %v679_v50  ;;  %v857_v54 = vadd.f32 %v813_v38, %v695_v52  ;;  %v1184_v55 = vpop.f32.mrb[23].mxu1 }
 0x115   : > { %v648_v57 = vpop.f32.mrb[24].mxu0 }
 0x116   : > { %866 = vst.msk [vmem:[#allocation2] sm:$0xff] %vm325_vm3, %v857_v54  ;;  %v680_v58 = vadd.f32 %v648_v57, %v518_v56  ;;  %v1154_v59 = vpop.f32.mrb[25].mxu0 }
 0x117   : > { %v696_v60 = vld [vmem:[#allocation2 + $0x8] sm:$0xff]  ;;  %v828_v61 = vpop.f32.mrb[24].mxu1  ;;  %v523_v40 = vld [vmem:[#allocation2 + $0x40] sm:$0xff] }
 0x118   : > { %689 = vst.msk [vmem:[#allocation2 + $0x18] sm:$0xff] %vm325_vm3, %v680_v58  ;;  %v858_v62 = vadd.f32 %v818_v46, %v696_v60  ;;  %v1187_v63 = vpop.f32.mrb[25].mxu1 }
 0x119   : > { %v653_v1 = vpop.f32.mrb[26].mxu0 }
 0x11a   : > { %867 = vst.msk [vmem:[#allocation2 + $0x8] sm:$0xff] %vm325_vm3, %v858_v62  ;;  %v681_v2 = vadd.f32 %v653_v1, %v519_v0  ;;  %v1157_v3 = vpop.f32.mrb[27].mxu0 }
 0x11b   : > { %v697_v5 = vld [vmem:[#allocation2 + $0x10] sm:$0xff]  ;;  %v833_v6 = vpop.f32.mrb[26].mxu1 }
 0x11c   : > { %690 = vst.msk [vmem:[#allocation2 + $0x20] sm:$0xff] %vm325_vm3, %v681_v2  ;;  %v859_v7 = vadd.f32 %v823_v53, %v697_v5  ;;  %v1190_v8 = vpop.f32.mrb[27].mxu1 }
 0x11d   : > { %v875_v9 = vld [vmem:[#allocation2] sm:$0xff]  ;;  %v658_v11 = vpop.f32.mrb[28].mxu0 }
 0x11e   : > { %v891_v12 = vadd.f32 %v1483_v4, %v875_v9  ;;  %868 = vst.msk [vmem:[#allocation2 + $0x10] sm:$0xff] %vm325_vm3, %v859_v7  ;;  %v682_v13 = vadd.f32 %v658_v11, %v520_v10  ;;  %v1160_v14 = vpop.f32.mrb[29].mxu0 }
 0x11f   : > { %v698_v15 = vld [vmem:[#allocation2 + $0x18] sm:$0xff]  ;;  %v838_v16 = vpop.f32.mrb[28].mxu1 }
 0x120   : > { %900 = vst.msk [vmem:[%s1489_s13] sm:$0xff] %vm325_vm3, %v891_v12  ;;  %691 = vst.msk [vmem:[#allocation2 + $0x28] sm:$0xff] %vm325_vm3, %v682_v13  ;;  %v860_v17 = vadd.f32 %v828_v61, %v698_v15  ;;  %v1193_v18 = vpop.f32.mrb[29].mxu1 }
 0x121   : > { %v876_v19 = vld [vmem:[#allocation2 + $0x8] sm:$0xff]  ;;  %v663_v21 = vpop.f32.mrb[30].mxu0 }
 0x122   : > { %v892_v22 = vadd.f32 %v1483_v4, %v876_v19  ;;  %869 = vst.msk [vmem:[#allocation2 + $0x18] sm:$0xff] %vm325_vm3, %v860_v17  ;;  %v683_v23 = vadd.f32 %v663_v21, %v521_v20  ;;  %v1163_v24 = vpop.f32.mrb[31].mxu0 }
 0x123   : > { %v699_v25 = vld [vmem:[#allocation2 + $0x20] sm:$0xff]  ;;  %v843_v26 = vpop.f32.mrb[30].mxu1 }
 0x124   : > { %901 = vst.msk [vmem:[%s1489_s13 + $0x8] sm:$0xff] %vm325_vm3, %v892_v22  ;;  %692 = vst.msk [vmem:[#allocation2 + $0x30] sm:$0xff] %vm325_vm3, %v683_v23  ;;  %v861_v27 = vadd.f32 %v833_v6, %v699_v25  ;;  %v1196_v28 = vpop.f32.mrb[31].mxu1 }
 0x125   : > { %v877_v29 = vld [vmem:[#allocation2 + $0x10] sm:$0xff]  ;;  %v668_v31 = vpop.f32.mrb[32].mxu0 }
 0x126   : > { %v893_v32 = vadd.f32 %v1483_v4, %v877_v29  ;;  %870 = vst.msk [vmem:[#allocation2 + $0x20] sm:$0xff] %vm325_vm3, %v861_v27  ;;  %v684_v33 = vadd.f32 %v668_v31, %v522_v30  ;;  %v1166_v34 = vpop.f32.mrb[33].mxu0 }
 0x127   : > { %v700_v35 = vld [vmem:[#allocation2 + $0x28] sm:$0xff]  ;;  %v848_v36 = vpop.f32.mrb[32].mxu1 }
 0x128   : > { %902 = vst.msk [vmem:[%s1489_s13 + $0x10] sm:$0xff] %vm325_vm3, %v893_v32  ;;  %693 = vst.msk [vmem:[#allocation2 + $0x38] sm:$0xff] %vm325_vm3, %v684_v33  ;;  %v862_v37 = vadd.f32 %v838_v16, %v700_v35  ;;  %v1199_v38 = vpop.f32.mrb[33].mxu1 }
 0x129   : > { %v878_v39 = vld [vmem:[#allocation2 + $0x18] sm:$0xff]  ;;  %v673_v41 = vpop.f32.mrb[34].mxu0 }
 0x12a   : > { %v894_v42 = vadd.f32 %v1483_v4, %v878_v39  ;;  %871 = vst.msk [vmem:[#allocation2 + $0x28] sm:$0xff] %vm325_vm3, %v862_v37  ;;  %v685_v43 = vadd.f32 %v673_v41, %v523_v40  ;;  %v1169_v44 = vpop.f32.mrb[35].mxu0 }
 0x12b   : > { %v701_v45 = vld [vmem:[#allocation2 + $0x30] sm:$0xff]  ;;  %v853_v46 = vpop.f32.mrb[34].mxu1 }
 0x12c   : > { %903 = vst.msk [vmem:[%s1489_s13 + $0x18] sm:$0xff] %vm325_vm3, %v894_v42  ;;  %694 = vst.msk [vmem:[#allocation2 + $0x40] sm:$0xff] %vm325_vm3, %v685_v43  ;;  %v863_v47 = vadd.f32 %v843_v26, %v701_v45  ;;  %v1202_v48 = vpop.f32.mrb[35].mxu1 }
 0x12d   : > { %v879_v49 = vld [vmem:[#allocation2 + $0x20] sm:$0xff] }
 0x12e   : > { %v895_v50 = vadd.f32 %v1483_v4, %v879_v49  ;;  %872 = vst.msk [vmem:[#allocation2 + $0x30] sm:$0xff] %vm325_vm3, %v863_v47 }
 0x12f   : > { %v702_v51 = vld [vmem:[#allocation2 + $0x38] sm:$0xff] }
 0x130   : > { %904 = vst.msk [vmem:[%s1489_s13 + $0x20] sm:$0xff] %vm325_vm3, %v895_v50  ;;  %v864_v52 = vadd.f32 %v848_v36, %v702_v51 }
 0x131   : > { %v880_v53 = vld [vmem:[#allocation2 + $0x28] sm:$0xff] }
 0x132   : > { %v896_v54 = vadd.f32 %v1483_v4, %v880_v53  ;;  %873 = vst.msk [vmem:[#allocation2 + $0x38] sm:$0xff] %vm325_vm3, %v864_v52 }
 0x133   : > { %v703_v55 = vld [vmem:[#allocation2 + $0x40] sm:$0xff] }
 0x134   : > { %905 = vst.msk [vmem:[%s1489_s13 + $0x28] sm:$0xff] %vm325_vm3, %v896_v54  ;;  %v865_v56 = vadd.f32 %v853_v46, %v703_v55 }
 0x135   : > { %v881_v57 = vld [vmem:[#allocation2 + $0x30] sm:$0xff] }
 0x136   : > { %v897_v58 = vadd.f32 %v1483_v4, %v881_v57  ;;  %874 = vst.msk [vmem:[#allocation2 + $0x40] sm:$0xff] %vm325_vm3, %v865_v56 }
 0x138   : > { %906 = vst.msk [vmem:[%s1489_s13 + $0x30] sm:$0xff] %vm325_vm3, %v897_v58 }
 0x139   : > { %v882_v59 = vld [vmem:[#allocation2 + $0x38] sm:$0xff] }
 0x13a   : > { %v898_v60 = vadd.f32 %v1483_v4, %v882_v59 }
 0x13c   : > { %907 = vst.msk [vmem:[%s1489_s13 + $0x38] sm:$0xff] %vm325_vm3, %v898_v60 }
 0x13d   : > { %v883_v61 = vld [vmem:[#allocation2 + $0x40] sm:$0xff] }
 0x13e   : > { %v899_v62 = vadd.f32 %v1483_v4, %v883_v61 }
 0x140   : > { %908 = vst.msk [vmem:[%s1489_s13 + $0x40] sm:$0xff] %vm325_vm3, %v899_v62 }
 0x141 PF: > { %s13_s12 = sadd.s32 1, %s1234_s12  }
 0x142   : > { %p10_p4 = scmp.ge.s32.totalorder %s13_s12, 4  }
 0x144   :  { %12 = sbr.rel (!%p10_p4) target bundleno = 1 (0x1), region = 65 }

</bundles_post_ra>
